<compile_context>
chip_gen: v5e
topology: v5e:2x2
jax: 0.10.0
libtpu: 0.0.40
codegen_flags: <defaults>
</compile_context>

<pallas_src>
import jax
import jax.numpy as jnp
from jax.experimental import pallas as pl
from jax.experimental.pallas import tpu as pltpu

LEAKY_SLOPE = 0.01
BN_EPS = 1e-5
LANE = 128


def _round_up(n, m):
    return ((n + m - 1) // m) * m


def _fused_layer(x_bf16, w_ref, b_ref, t_ref):
    """(folded) Linear -> bias -> LeakyReLU -> +BN-shift. f32 elementwise math."""
    h = jnp.dot(x_bf16, w_ref[...], preferred_element_type=jnp.float32)
    h = h + b_ref[...]
    h = jnp.where(h >= 0.0, h, LEAKY_SLOPE * h)
    h = h + t_ref[...]
    return h.astype(jnp.bfloat16)  # next matmul operand back to bf16


def bnet_kernel(x_ref,
                w1, b1, t1,
                w2, b2, t2,
                w3, b3, t3,
                w4, b4, t4,
                w5, b5,
                o_ref):
    x = x_ref[...]                      # (bt, in) bf16
    x = _fused_layer(x, w1, b1, t1)
    x = _fused_layer(x, w2, b2, t2)
    x = _fused_layer(x, w3, b3, t3)
    x = _fused_layer(x, w4, b4, t4)
    # Final Linear: lane-dense (128-padded) f32 store.
    o_ref[...] = jnp.dot(x, w5[...], preferred_element_type=jnp.float32) + b5[...]


def _prepare_kernel_params(params, out_pad):
    """Fold BN scale into W/b, cast matmul operands to bf16, pad last layer."""
    flat = []
    for i in (1, 2, 3, 4):
        s = params[f"s{i}"]
        # leaky(z*s) == s*leaky(z) requires s > 0 (true for standard BN eval).
        assert bool(jnp.all(s > 0.0)), "BN fold requires strictly positive scale"
        wf = (params[f"w{i}"] * s).astype(jnp.bfloat16)
        bf = (params[f"b{i}"] * s).astype(jnp.float32)
        tf = params[f"t{i}"].astype(jnp.float32)
        flat += [wf, bf, tf]
    w5, b5 = params["w5"], params["b5"]
    dout = w5.shape[1]
    w5p = jnp.pad(w5, ((0, 0), (0, out_pad - dout))).astype(jnp.bfloat16)
    b5p = jnp.pad(b5, ((0, 0), (0, out_pad - dout))).astype(jnp.float32)
    flat += [w5p, b5p]
    return flat


def bnet_forward(x, params, *, batch_tile=512):
    """x: (B, in_channels) float32. params: dict of weights (see init_params)."""
    B, din = x.shape
    out_dim = params["w5"].shape[1]
    out_pad = _round_up(out_dim, LANE)

    # Large batch tiles (multiples of 8; default 512). Small batches collapse
    # to a single grid step; arbitrary B handled via zero-padding + slice.
    bt = _round_up(min(batch_tile, _round_up(B, 8)), 8)
    Bp = _round_up(B, bt)

    xk = x.astype(jnp.bfloat16)
    if Bp != B:
        xk = jnp.pad(xk, ((0, Bp - B), (0, 0)))

    flat = _prepare_kernel_params(params, out_pad)

    x_spec = pl.BlockSpec((bt, din), lambda i: (i, 0))
    out_spec = pl.BlockSpec((bt, out_pad), lambda i: (i, 0))
    # Replicated params: full blocks with constant index_map -> DMA'd once and
    # reused; ndim bound as default arg (avoids late-binding bug).
    param_specs = [pl.BlockSpec(p.shape, lambda i, nd=p.ndim: (0,) * nd)
                   for p in flat]

    out = pl.pallas_call(
        bnet_kernel,
        out_shape=jax.ShapeDtypeStruct((Bp, out_pad), jnp.float32),
        grid_spec=pltpu.PrefetchScalarGridSpec(
            num_scalar_prefetch=0,
            grid=(Bp // bt,),
            in_specs=[x_spec] + param_specs,
            out_specs=out_spec,
        ),
        compiler_params=pltpu.CompilerParams(
            dimension_semantics=("parallel",)),
    )(xk, *flat)

    return out[:B, :out_dim]


def init_params(key, layerweigths, in_channels, out_channels):
    """Deterministic synthetic parameters with the shapes BNET.__init__ implies."""
    dims = [in_channels] + [lw * out_channels for lw in layerweigths] + [out_channels]
    params = {}
    keys = jax.random.split(key, 5 * 4)
    ki = 0
    for layer in range(1, 6):
        din, dout = dims[layer - 1], dims[layer]
        # Linear weight stored as (in, out) so the kernel computes x @ W + b
        # (same math as PyTorch's x @ W^T with W of shape (out, in)).
        w = jax.random.normal(keys[ki], (din, dout), jnp.float32) * 0.1; ki += 1
        b = jax.random.normal(keys[ki], (1, dout), jnp.float32) * 0.1; ki += 1
        params[f"w{layer}"] = w
        params[f"b{layer}"] = b
        if layer <= 4:
            # BatchNorm1d(dout): gamma, beta, running_mean, running_var (eval).
            gamma = 1.0 + 0.1 * jax.random.normal(keys[ki], (1, dout), jnp.float32); ki += 1
            beta = 0.1 * jax.random.normal(keys[ki], (1, dout), jnp.float32); ki += 1
            running_mean = jnp.zeros((1, dout), jnp.float32)
            running_var = jnp.ones((1, dout), jnp.float32)
            scale = gamma / jnp.sqrt(running_var + BN_EPS)
            shift = beta - running_mean * scale
            params[f"s{layer}"] = scale
            params[f"t{layer}"] = shift
    return params


def bnet_reference(x, params):
    """Plain-JAX f32 reference of the same eval-mode forward."""
    h = x
    for i in (1, 2, 3, 4):
        h = h @ params[f"w{i}"] + params[f"b{i}"]
        h = jnp.where(h >= 0.0, h, LEAKY_SLOPE * h)
        h = h * params[f"s{i}"] + params[f"t{i}"]
    return h @ params["w5"] + params["b5"]


if __name__ == "__main__":
    # Small config consistent with the module:
    #   layerweigths = [8, 8, 4, 4], in_channels = 32, out_channels = 8
    #   hidden dims -> 64, 64, 32, 32, output 8; batch = 16.
    layerweigths = [8, 8, 4, 4]
    in_channels, out_channels = 32, 8
    batch = 16

    key = jax.random.PRNGKey(0)
    kx, kp = jax.random.split(key)
    x = jax.random.normal(kx, (batch, in_channels), jnp.float32)
    params = init_params(kp, layerweigths, in_channels, out_channels)

    out = bnet_forward(x, params, batch_tile=512)
    out = jax.block_until_ready(out)

    ref = bnet_reference(x, params)
    assert out.shape == (batch, out_channels)
    # Relaxed tolerance: matmul operands are bf16 (accumulation in f32).
    assert jnp.allclose(out, ref, atol=5e-2, rtol=5e-2), "mismatch vs reference"
    print("KERNEL_OK")
</pallas_src>

<mosaic_0001>
module attributes {stable_mosaic.version = 11 : i64} {
  func.func @bnet_kernel(%arg0: i32, %arg1: memref<16x32xbf16, #tpu.memory_space<vmem>>, %arg2: memref<32x64xbf16, #tpu.memory_space<vmem>>, %arg3: memref<1x64xf32, #tpu.memory_space<vmem>>, %arg4: memref<1x64xf32, #tpu.memory_space<vmem>>, %arg5: memref<64x64xbf16, #tpu.memory_space<vmem>>, %arg6: memref<1x64xf32, #tpu.memory_space<vmem>>, %arg7: memref<1x64xf32, #tpu.memory_space<vmem>>, %arg8: memref<64x32xbf16, #tpu.memory_space<vmem>>, %arg9: memref<1x32xf32, #tpu.memory_space<vmem>>, %arg10: memref<1x32xf32, #tpu.memory_space<vmem>>, %arg11: memref<32x32xbf16, #tpu.memory_space<vmem>>, %arg12: memref<1x32xf32, #tpu.memory_space<vmem>>, %arg13: memref<1x32xf32, #tpu.memory_space<vmem>>, %arg14: memref<32x128xbf16, #tpu.memory_space<vmem>>, %arg15: memref<1x128xf32, #tpu.memory_space<vmem>>, %arg16: memref<16x128xf32, #tpu.memory_space<vmem>>) attributes {dimension_semantics = [#tpu.dimension_semantics<parallel>], iteration_bounds = array<i64: 1>, scalar_prefetch = 0 : i64, scratch_operands = 0 : i64, tpu.core_type = #tpu.core_type<tc>, window_params = [{transform_indices = @transform_0, window_bounds = array<i64: 16, 32>}, {pipeline_mode = #tpu.pipeline_mode<synchronous>, transform_indices = @transform_1, window_bounds = array<i64: 32, 64>}, {pipeline_mode = #tpu.pipeline_mode<synchronous>, transform_indices = @transform_2, window_bounds = array<i64: 1, 64>}, {pipeline_mode = #tpu.pipeline_mode<synchronous>, transform_indices = @transform_3, window_bounds = array<i64: 1, 64>}, {pipeline_mode = #tpu.pipeline_mode<synchronous>, transform_indices = @transform_4, window_bounds = array<i64: 64, 64>}, {pipeline_mode = #tpu.pipeline_mode<synchronous>, transform_indices = @transform_5, window_bounds = array<i64: 1, 64>}, {pipeline_mode = #tpu.pipeline_mode<synchronous>, transform_indices = @transform_6, window_bounds = array<i64: 1, 64>}, {pipeline_mode = #tpu.pipeline_mode<synchronous>, transform_indices = @transform_7, window_bounds = array<i64: 64, 32>}, {pipeline_mode = #tpu.pipeline_mode<synchronous>, transform_indices = @transform_8, window_bounds = array<i64: 1, 32>}, {pipeline_mode = #tpu.pipeline_mode<synchronous>, transform_indices = @transform_9, window_bounds = array<i64: 1, 32>}, {pipeline_mode = #tpu.pipeline_mode<synchronous>, transform_indices = @transform_10, window_bounds = array<i64: 32, 32>}, {pipeline_mode = #tpu.pipeline_mode<synchronous>, transform_indices = @transform_11, window_bounds = array<i64: 1, 32>}, {pipeline_mode = #tpu.pipeline_mode<synchronous>, transform_indices = @transform_12, window_bounds = array<i64: 1, 32>}, {pipeline_mode = #tpu.pipeline_mode<synchronous>, transform_indices = @transform_13, window_bounds = array<i64: 32, 128>}, {pipeline_mode = #tpu.pipeline_mode<synchronous>, transform_indices = @transform_14, window_bounds = array<i64: 1, 128>}, {transform_indices = @transform_15, window_bounds = array<i64: 16, 128>}]} {
    %c0 = arith.constant 0 : index
    %c0_0 = arith.constant 0 : index
    %0 = vector.load %arg1[%c0, %c0_0] : memref<16x32xbf16, #tpu.memory_space<vmem>>, vector<16x32xbf16>
    %c0_1 = arith.constant 0 : index
    %c0_2 = arith.constant 0 : index
    %1 = vector.load %arg2[%c0_1, %c0_2] : memref<32x64xbf16, #tpu.memory_space<vmem>>, vector<32x64xbf16>
    %cst = arith.constant dense<0.000000e+00> : vector<16x64xf32>
    %2 = tpu.matmul %0, %1, %cst {dimension_numbers = #tpu.dot_dimension_numbers<[1], [0], [0], [1], [0, 0, 1, 1], [], []>} : vector<16x32xbf16>, vector<32x64xbf16>, vector<16x64xf32> -> vector<16x64xf32>
    %c0_3 = arith.constant 0 : index
    %c0_4 = arith.constant 0 : index
    %3 = vector.load %arg3[%c0_3, %c0_4] : memref<1x64xf32, #tpu.memory_space<vmem>>, vector<1x64xf32>
    %4 = vector.broadcast %3 : vector<1x64xf32> to vector<16x64xf32>
    %5 = arith.addf %2, %4 : vector<16x64xf32>
    %cst_5 = arith.constant 0.000000e+00 : f32
    %6 = vector.broadcast %cst_5 : f32 to vector<16x64xf32>
    %7 = arith.cmpf oge, %5, %6 : vector<16x64xf32>
    %cst_6 = arith.constant 0.00999999977 : f32
    %8 = vector.broadcast %cst_6 : f32 to vector<16x64xf32>
    %9 = arith.mulf %8, %5 : vector<16x64xf32>
    %10 = arith.select %7, %5, %9 : vector<16x64xi1>, vector<16x64xf32>
    %c0_7 = arith.constant 0 : index
    %c0_8 = arith.constant 0 : index
    %11 = vector.load %arg4[%c0_7, %c0_8] : memref<1x64xf32, #tpu.memory_space<vmem>>, vector<1x64xf32>
    %12 = vector.broadcast %11 : vector<1x64xf32> to vector<16x64xf32>
    %13 = arith.addf %10, %12 : vector<16x64xf32>
    %14 = arith.truncf %13 : vector<16x64xf32> to vector<16x64xbf16>
    %c0_9 = arith.constant 0 : index
    %c0_10 = arith.constant 0 : index
    %15 = vector.load %arg5[%c0_9, %c0_10] : memref<64x64xbf16, #tpu.memory_space<vmem>>, vector<64x64xbf16>
    %cst_11 = arith.constant dense<0.000000e+00> : vector<16x64xf32>
    %16 = tpu.matmul %14, %15, %cst_11 {dimension_numbers = #tpu.dot_dimension_numbers<[1], [0], [0], [1], [0, 0, 1, 1], [], []>} : vector<16x64xbf16>, vector<64x64xbf16>, vector<16x64xf32> -> vector<16x64xf32>
    %c0_12 = arith.constant 0 : index
    %c0_13 = arith.constant 0 : index
    %17 = vector.load %arg6[%c0_12, %c0_13] : memref<1x64xf32, #tpu.memory_space<vmem>>, vector<1x64xf32>
    %18 = vector.broadcast %17 : vector<1x64xf32> to vector<16x64xf32>
    %19 = arith.addf %16, %18 : vector<16x64xf32>
    %cst_14 = arith.constant 0.000000e+00 : f32
    %20 = vector.broadcast %cst_14 : f32 to vector<16x64xf32>
    %21 = arith.cmpf oge, %19, %20 : vector<16x64xf32>
    %cst_15 = arith.constant 0.00999999977 : f32
    %22 = vector.broadcast %cst_15 : f32 to vector<16x64xf32>
    %23 = arith.mulf %22, %19 : vector<16x64xf32>
    %24 = arith.select %21, %19, %23 : vector<16x64xi1>, vector<16x64xf32>
    %c0_16 = arith.constant 0 : index
    %c0_17 = arith.constant 0 : index
    %25 = vector.load %arg7[%c0_16, %c0_17] : memref<1x64xf32, #tpu.memory_space<vmem>>, vector<1x64xf32>
    %26 = vector.broadcast %25 : vector<1x64xf32> to vector<16x64xf32>
    %27 = arith.addf %24, %26 : vector<16x64xf32>
    %28 = arith.truncf %27 : vector<16x64xf32> to vector<16x64xbf16>
    %c0_18 = arith.constant 0 : index
    %c0_19 = arith.constant 0 : index
    %29 = vector.load %arg8[%c0_18, %c0_19] : memref<64x32xbf16, #tpu.memory_space<vmem>>, vector<64x32xbf16>
    %cst_20 = arith.constant dense<0.000000e+00> : vector<16x32xf32>
    %30 = tpu.matmul %28, %29, %cst_20 {dimension_numbers = #tpu.dot_dimension_numbers<[1], [0], [0], [1], [0, 0, 1, 1], [], []>} : vector<16x64xbf16>, vector<64x32xbf16>, vector<16x32xf32> -> vector<16x32xf32>
    %c0_21 = arith.constant 0 : index
    %c0_22 = arith.constant 0 : index
    %31 = vector.load %arg9[%c0_21, %c0_22] : memref<1x32xf32, #tpu.memory_space<vmem>>, vector<1x32xf32>
    %32 = vector.broadcast %31 : vector<1x32xf32> to vector<16x32xf32>
    %33 = arith.addf %30, %32 : vector<16x32xf32>
    %cst_23 = arith.constant 0.000000e+00 : f32
    %34 = vector.broadcast %cst_23 : f32 to vector<16x32xf32>
    %35 = arith.cmpf oge, %33, %34 : vector<16x32xf32>
    %cst_24 = arith.constant 0.00999999977 : f32
    %36 = vector.broadcast %cst_24 : f32 to vector<16x32xf32>
    %37 = arith.mulf %36, %33 : vector<16x32xf32>
    %38 = arith.select %35, %33, %37 : vector<16x32xi1>, vector<16x32xf32>
    %c0_25 = arith.constant 0 : index
    %c0_26 = arith.constant 0 : index
    %39 = vector.load %arg10[%c0_25, %c0_26] : memref<1x32xf32, #tpu.memory_space<vmem>>, vector<1x32xf32>
    %40 = vector.broadcast %39 : vector<1x32xf32> to vector<16x32xf32>
    %41 = arith.addf %38, %40 : vector<16x32xf32>
    %42 = arith.truncf %41 : vector<16x32xf32> to vector<16x32xbf16>
    %c0_27 = arith.constant 0 : index
    %c0_28 = arith.constant 0 : index
    %43 = vector.load %arg11[%c0_27, %c0_28] : memref<32x32xbf16, #tpu.memory_space<vmem>>, vector<32x32xbf16>
    %cst_29 = arith.constant dense<0.000000e+00> : vector<16x32xf32>
    %44 = tpu.matmul %42, %43, %cst_29 {dimension_numbers = #tpu.dot_dimension_numbers<[1], [0], [0], [1], [0, 0, 1, 1], [], []>} : vector<16x32xbf16>, vector<32x32xbf16>, vector<16x32xf32> -> vector<16x32xf32>
    %c0_30 = arith.constant 0 : index
    %c0_31 = arith.constant 0 : index
    %45 = vector.load %arg12[%c0_30, %c0_31] : memref<1x32xf32, #tpu.memory_space<vmem>>, vector<1x32xf32>
    %46 = vector.broadcast %45 : vector<1x32xf32> to vector<16x32xf32>
    %47 = arith.addf %44, %46 : vector<16x32xf32>
    %cst_32 = arith.constant 0.000000e+00 : f32
    %48 = vector.broadcast %cst_32 : f32 to vector<16x32xf32>
    %49 = arith.cmpf oge, %47, %48 : vector<16x32xf32>
    %cst_33 = arith.constant 0.00999999977 : f32
    %50 = vector.broadcast %cst_33 : f32 to vector<16x32xf32>
    %51 = arith.mulf %50, %47 : vector<16x32xf32>
    %52 = arith.select %49, %47, %51 : vector<16x32xi1>, vector<16x32xf32>
    %c0_34 = arith.constant 0 : index
    %c0_35 = arith.constant 0 : index
    %53 = vector.load %arg13[%c0_34, %c0_35] : memref<1x32xf32, #tpu.memory_space<vmem>>, vector<1x32xf32>
    %54 = vector.broadcast %53 : vector<1x32xf32> to vector<16x32xf32>
    %55 = arith.addf %52, %54 : vector<16x32xf32>
    %56 = arith.truncf %55 : vector<16x32xf32> to vector<16x32xbf16>
    %c0_36 = arith.constant 0 : index
    %c0_37 = arith.constant 0 : index
    %57 = vector.load %arg14[%c0_36, %c0_37] : memref<32x128xbf16, #tpu.memory_space<vmem>>, vector<32x128xbf16>
    %cst_38 = arith.constant dense<0.000000e+00> : vector<16x128xf32>
    %58 = tpu.matmul %56, %57, %cst_38 {dimension_numbers = #tpu.dot_dimension_numbers<[1], [0], [0], [1], [0, 0, 1, 1], [], []>} : vector<16x32xbf16>, vector<32x128xbf16>, vector<16x128xf32> -> vector<16x128xf32>
    %c0_39 = arith.constant 0 : index
    %c0_40 = arith.constant 0 : index
    %59 = vector.load %arg15[%c0_39, %c0_40] : memref<1x128xf32, #tpu.memory_space<vmem>>, vector<1x128xf32>
    %60 = vector.broadcast %59 : vector<1x128xf32> to vector<16x128xf32>
    %61 = arith.addf %58, %60 : vector<16x128xf32>
    %c0_41 = arith.constant 0 : index
    %c0_42 = arith.constant 0 : index
    %62 = vector.load %arg16[%c0_41, %c0_42] : memref<16x128xf32, #tpu.memory_space<vmem>>, vector<16x128xf32>
    tpu.vector_store %arg16[%c0_41, %c0_42], %61 {strides = array<i32>} : memref<16x128xf32, #tpu.memory_space<vmem>>, vector<16x128xf32>,
    return
  }
  func.func @transform_0(%arg0: i32) -> (i32, i32) {
    %c0_i32 = arith.constant 0 : i32
    %c0_i32_0 = arith.constant 0 : i32
    return %arg0, %c0_i32 : i32, i32
  }
  func.func @transform_1(%arg0: i32) -> (i32, i32) {
    %c0_i32 = arith.constant 0 : i32
    %c0_i32_0 = arith.constant 0 : i32
    %c0_i32_1 = arith.constant 0 : i32
    return %c0_i32, %c0_i32_0 : i32, i32
  }
  func.func @transform_2(%arg0: i32) -> (i32, i32) {
    %c0_i32 = arith.constant 0 : i32
    %c0_i32_0 = arith.constant 0 : i32
    %c0_i32_1 = arith.constant 0 : i32
    return %c0_i32, %c0_i32_0 : i32, i32
  }
  func.func @transform_3(%arg0: i32) -> (i32, i32) {
    %c0_i32 = arith.constant 0 : i32
    %c0_i32_0 = arith.constant 0 : i32
    %c0_i32_1 = arith.constant 0 : i32
    return %c0_i32, %c0_i32_0 : i32, i32
  }
  func.func @transform_4(%arg0: i32) -> (i32, i32) {
    %c0_i32 = arith.constant 0 : i32
    %c0_i32_0 = arith.constant 0 : i32
    %c0_i32_1 = arith.constant 0 : i32
    return %c0_i32, %c0_i32_0 : i32, i32
  }
  func.func @transform_5(%arg0: i32) -> (i32, i32) {
    %c0_i32 = arith.constant 0 : i32
    %c0_i32_0 = arith.constant 0 : i32
    %c0_i32_1 = arith.constant 0 : i32
    return %c0_i32, %c0_i32_0 : i32, i32
  }
  func.func @transform_6(%arg0: i32) -> (i32, i32) {
    %c0_i32 = arith.constant 0 : i32
    %c0_i32_0 = arith.constant 0 : i32
    %c0_i32_1 = arith.constant 0 : i32
    return %c0_i32, %c0_i32_0 : i32, i32
  }
  func.func @transform_7(%arg0: i32) -> (i32, i32) {
    %c0_i32 = arith.constant 0 : i32
    %c0_i32_0 = arith.constant 0 : i32
    %c0_i32_1 = arith.constant 0 : i32
    return %c0_i32, %c0_i32_0 : i32, i32
  }
  func.func @transform_8(%arg0: i32) -> (i32, i32) {
    %c0_i32 = arith.constant 0 : i32
    %c0_i32_0 = arith.constant 0 : i32
    %c0_i32_1 = arith.constant 0 : i32
    return %c0_i32, %c0_i32_0 : i32, i32
  }
  func.func @transform_9(%arg0: i32) -> (i32, i32) {
    %c0_i32 = arith.constant 0 : i32
    %c0_i32_0 = arith.constant 0 : i32
    %c0_i32_1 = arith.constant 0 : i32
    return %c0_i32, %c0_i32_0 : i32, i32
  }
  func.func @transform_10(%arg0: i32) -> (i32, i32) {
    %c0_i32 = arith.constant 0 : i32
    %c0_i32_0 = arith.constant 0 : i32
    %c0_i32_1 = arith.constant 0 : i32
    return %c0_i32, %c0_i32_0 : i32, i32
  }
  func.func @transform_11(%arg0: i32) -> (i32, i32) {
    %c0_i32 = arith.constant 0 : i32
    %c0_i32_0 = arith.constant 0 : i32
    %c0_i32_1 = arith.constant 0 : i32
    return %c0_i32, %c0_i32_0 : i32, i32
  }
  func.func @transform_12(%arg0: i32) -> (i32, i32) {
    %c0_i32 = arith.constant 0 : i32
    %c0_i32_0 = arith.constant 0 : i32
    %c0_i32_1 = arith.constant 0 : i32
    return %c0_i32, %c0_i32_0 : i32, i32
  }
  func.func @transform_13(%arg0: i32) -> (i32, i32) {
    %c0_i32 = arith.constant 0 : i32
    %c0_i32_0 = arith.constant 0 : i32
    %c0_i32_1 = arith.constant 0 : i32
    return %c0_i32, %c0_i32_0 : i32, i32
  }
  func.func @transform_14(%arg0: i32) -> (i32, i32) {
    %c0_i32 = arith.constant 0 : i32
    %c0_i32_0 = arith.constant 0 : i32
    %c0_i32_1 = arith.constant 0 : i32
    return %c0_i32, %c0_i32_0 : i32, i32
  }
  func.func @transform_15(%arg0: i32) -> (i32, i32) {
    %c0_i32 = arith.constant 0 : i32
    %c0_i32_0 = arith.constant 0 : i32
    return %arg0, %c0_i32 : i32, i32
  }
}

</mosaic_0001>

<bundles_post_ra>
// kernel: tpu_custom_call.1
= control target key start
LH: loop header
LB: loop body
LE: loop exit
PB: predicated region body
PF: predicated region fallthrough
CT: control target
= control target key end

     0   :  { %20 = vsyncpa [#allocation3], 0  ;;  %s760_s0 = inlined_call_operand.hbm [shape: bf16[16,32], index: 0, kind: input, shape index: {}]   ;;  %s761_s1 = inlined_call_operand.vmem [shape: bf16[32,64], index: 1, kind: input, shape index: {}]   ;;  %s762_s2 = inlined_call_operand.vmem [shape: f32[1,64], index: 2, kind: input, shape index: {}]   ;;  %s763_s3 = inlined_call_operand.vmem [shape: f32[1,64], index: 3, kind: input, shape index: {}]   ;;  %s764_s4 = inlined_call_operand.vmem [shape: bf16[64,64], index: 4, kind: input, shape index: {}]   ;;  %s765_s5 = inlined_call_operand.vmem [shape: f32[1,64], index: 5, kind: input, shape index: {}]   ;;  %s766_s6 = inlined_call_operand.vmem [shape: f32[1,64], index: 6, kind: input, shape index: {}]   ;;  %s767_s7 = inlined_call_operand.vmem [shape: bf16[64,32], index: 7, kind: input, shape index: {}]   ;;  %s768_s8 = inlined_call_operand.vmem [shape: f32[1,32], index: 8, kind: input, shape index: {}]   ;;  %s769_s9 = inlined_call_operand.vmem [shape: f32[1,32], index: 9, kind: input, shape index: {}]   ;;  %s770_s10 = inlined_call_operand.hbm [shape: bf16[32,32], index: 10, kind: input, shape index: {}]   ;;  %s771_s11 = inlined_call_operand.vmem [shape: f32[1,32], index: 11, kind: input, shape index: {}]   ;;  %s772_s12 = inlined_call_operand.vmem [shape: f32[1,32], index: 12, kind: input, shape index: {}]   ;;  %s773_s13 = inlined_call_operand.hbm [shape: bf16[32,128], index: 13, kind: input, shape index: {}]   ;;  %s774_s14 = inlined_call_operand.vmem [shape: f32[1,128], index: 14, kind: input, shape index: {}]   ;;  %s775_s15 = inlined_call_operand.hbm [shape: f32[16,128], index: 15, kind: output, shape index: {}]  }
   0x1   :  { %21 = vsyncpa [#allocation6], 0 }
   0x2   :  { %22 = vsyncpa [#allocation4], 0  ;;  %s58_s20 = sshll.u32 %s770_s10, 4  ;;  %s598_s21 = smov [#allocation5]   ;;  %s59_s20 = int_to_ptr.hbm [resolvable:$true] %s58_s20 }
   0x3   :  { %s60_s22 = sshll.u32 %s598_s21, 4  ;;  %s27_s25 = sshll.u32 %s760_s0, 4  ;;  %s61_s22 = int_to_ptr.vmem [resolvable:$true] %s60_s22  ;;  %s28_s25 = int_to_ptr.hbm [resolvable:$true] %s27_s25 }
   0x4   :  { %s599_s26 = smov 64   ;;  %s600_s27 = smov 4  }
   0x5   :  { %66 = dma.hbm_to_vmem [thread:$0]  %s59_s20, 256, %s61_s22, [#allocation6], %s599_s26, %s599_s26, %s600_s27  }
   0x6   :  { %s601_s28 = smov [#allocation2]   ;;  %s75_s17 = sshll.u32 %s773_s13, 4  ;;  %s76_s17 = int_to_ptr.hbm [resolvable:$true] %s75_s17 }
   0x7   :  { %s29_s29 = sshll.u32 %s601_s28, 4  ;;  %s602_s10 = smov [#allocation7]   ;;  %s30_s29 = int_to_ptr.vmem [resolvable:$true] %s29_s29 }
   0x8   :  { %35 = dma.hbm_to_vmem [thread:$0]  %s28_s25, 128, %s30_s29, [#allocation3], %s599_s26, %s599_s26, %s600_s27  }
   0x9   :  { %s77_s18 = sshll.u32 %s602_s10, 4  ;;  %s78_s18 = int_to_ptr.vmem [resolvable:$true] %s77_s18 }
   0xa   :  { %83 = dma.hbm_to_vmem [thread:$0]  %s76_s17, 256, %s78_s18, [#allocation6], %s599_s26, %s599_s26, %s600_s27  }
   0xb   :  { %592 = dma.done.wait [#allocation3], 128  }
   0xc   :  { %593 = vsyncadd [#allocation3], 4294967168 }
   0xd   :  { %594 = dma.done.wait [#allocation6], 512  }
   0xe   :  { %595 = vsyncadd [#allocation6], 4294966784  ;;  %v466_v0 = vld [vmem:[%s761_s1 + $0x8] sm:$0xff]  ;;  %v465_v1 = vld [vmem:[%s761_s1] sm:$0xff]  ;;  %vm126_vm0 = vcmask 261120   ;;  %vm193_vm3 = vcmask 523264  }
   0xf   :  { %136 = vmatpush.bf16.msra.mxu0 %v466_v0  ;;  %v464_v2 = vld [vmem:[#allocation2] sm:$0xff]  ;;  %v470_v3 = vld [vmem:[%s764_s4 + $0x18] sm:$0xff]  ;;  %v469_v4 = vld [vmem:[%s764_s4 + $0x10] sm:$0xff]  ;;  %s603_s1 = smov [#allocation8]   ;;  %s385_s29 = sshll.u32 %s775_s15, 4  ;;  %s386_s29 = int_to_ptr.hbm [resolvable:$true] %s385_s29 }
  0x10   :  { %201 = vmatpush.bf16.msra.mxu1 %v470_v3  ;;  %v468_v5 = vld [vmem:[%s764_s4 + $0x8] sm:$0xff]  ;;  %v467_v6 = vld [vmem:[%s764_s4] sm:$0xff]  ;;  %v474_v20 = vld [vmem:[%s767_s7 + $0x18] sm:$0xff]  ;;  %s383_s27 = sshll.u32 %s603_s1, 4  ;;  %s604_s30 = smov 128   ;;  %s384_s27 = int_to_ptr.vmem [resolvable:$true] %s383_s27 }
  0x11   :  { %v487_v7 = vld [vmem:[%s762_s2] ss:$0 sm:$0xff]  ;;  %267 = vmatpush.bf16.msra.mxu2 %v474_v20  ;;  %v473_v21 = vld [vmem:[%s767_s7 + $0x10] sm:$0xff]  ;;  %v472_v22 = vld [vmem:[%s767_s7 + $0x8] sm:$0xff]  ;;  %s605_s16 = smov 8  }
  0x12   :  { %v488_v13 = vld [vmem:[%s763_s3] ss:$0 sm:$0xff]  ;;  %v476_v37 = vld [vmem:[#allocation5 + $0x8] sm:$0xff]  ;;  %v475_v38 = vld [vmem:[#allocation5] sm:$0xff] }
  0x13   :  { %137 = vmatpush.bf16.msra.mxu0 %v465_v1  ;;  %v471_v23 = vld [vmem:[%s767_s7] sm:$0xff]  ;;  %319 = vmatpush.bf16.msra.mxu3 %v476_v37  ;;  %v477_v53 = vld [vmem:[#allocation7] sm:$0xff] }
  0x14   :  { %202 = vmatpush.bf16.msra.mxu1 %v469_v4  ;;  %v489_v24 = vld [vmem:[%s765_s5] ss:$0 sm:$0xff] }
  0x15   :  { %268 = vmatpush.bf16.msra.mxu2 %v473_v21  ;;  %v490_v30 = vld [vmem:[%s766_s6] ss:$0 sm:$0xff] }
  0x16   :  { %411 = vmatmul.msk.bf16.vlgmr.msra.gmra.mxu0 %vm126_vm0, %v464_v2  ;;  %v491_v39 = vld [vmem:[%s768_s8] ss:$0 sm:$0xff] }
  0x17   :  { %320 = vmatpush.bf16.msra.mxu3 %v475_v38  ;;  %v492_v45 = vld [vmem:[%s769_s9] ss:$0 sm:$0xff] }
  0x18   :  { %203 = vmatpush.bf16.msra.mxu1 %v468_v5  ;;  %v478_v52 = vld [vmem:[#allocation7 + $0x8] sm:$0xff] }
  0x19   :  { %269 = vmatpush.bf16.msra.mxu2 %v472_v22  ;;  %369 = vmatpush.bf16.msrb.mxu0 %v478_v52  ;;  %v493_v54 = vld [vmem:[%s771_s11] ss:$0 sm:$0xff] }
  0x1a   :  { %v494_v60 = vld [vmem:[%s772_s12] ss:$0 sm:$0xff] }
  0x1b   :  { %v495_v3 = vld [vmem:[%s774_s14] ss:$0 sm:$0xff] }
  0x1c   :  { %204 = vmatpush.bf16.msra.mxu1 %v467_v6 }
  0x1d   :  { %270 = vmatpush.bf16.msra.mxu2 %v471_v23  ;;  %370 = vmatpush.bf16.msrb.mxu0 %v477_v53 }
  0x93   :  { %v139_v8 = vpop.f32.mrf.mxu0 }
  0x94   :  { %v140_v9 = vadd.f32 %v487_v7, %v139_v8 }
  0x96   :  { %v146_v10 = vmul.f32 0.01, %v140_v9  ;;  %vm144_vm1 = vcmp.ge.f32.partialorder %v140_v9, 0.0 }
  0x98   :  { %v148_v14 = vsel %vm144_vm1, %v140_v9, %v146_v10 }
  0x99   :  { %v154_v17 = vadd.f32 %v488_v13, %v148_v14 }
  0x9b   :  { %v141_v11 = vpop.f32.mrf.mxu0 }
  0x9c   :  { %v142_v12 = vadd.f32 %v487_v7, %v141_v11 }
  0x9e   :  { %vm145_vm2 = vcmp.ge.f32.partialorder %v142_v12, 0.0  ;;  %v147_v15 = vmul.f32 0.01, %v142_v12 }
  0xa0   :  { %v149_v16 = vsel %vm145_vm2, %v142_v12, %v147_v15 }
  0xa1   :  { %v155_v18 = vadd.f32 %v488_v13, %v149_v16 }
  0xa3   :  { %v156_v19 = vpack.c.bf16 %v155_v18, %v154_v17 }
  0xa5   :  { %428 = vmatmul.msk.bf16.vlgmr.msra.gmra.mxu1 %vm193_vm3, %v156_v19 }
 0x122   :  { %v206_v25 = vpop.f32.mrf.mxu1 }
 0x123   :  { %v207_v26 = vadd.f32 %v489_v24, %v206_v25 }
 0x125   :  { %v213_v27 = vmul.f32 0.01, %v207_v26  ;;  %vm211_vm4 = vcmp.ge.f32.partialorder %v207_v26, 0.0 }
 0x127   :  { %v215_v31 = vsel %vm211_vm4, %v207_v26, %v213_v27 }
 0x128   :  { %v221_v34 = vadd.f32 %v490_v30, %v215_v31 }
 0x12a   :  { %v208_v28 = vpop.f32.mrf.mxu1 }
 0x12b   :  { %v209_v29 = vadd.f32 %v489_v24, %v208_v28 }
 0x12d   :  { %vm212_vm5 = vcmp.ge.f32.partialorder %v209_v29, 0.0  ;;  %v214_v32 = vmul.f32 0.01, %v209_v29 }
 0x12f   :  { %v216_v33 = vsel %vm212_vm5, %v209_v29, %v214_v32 }
 0x130   :  { %v222_v35 = vadd.f32 %v490_v30, %v216_v33 }
 0x132   :  { %v223_v36 = vpack.c.bf16 %v222_v35, %v221_v34 }
 0x134   :  { %445 = vmatmul.msk.bf16.vlgmr.msra.gmra.mxu2 %vm193_vm3, %v223_v36 }
 0x1b7   :  { %v272_v40 = vpop.f32.mrf.mxu2 }
 0x1b8   :  { %v273_v41 = vadd.f32 %v491_v39, %v272_v40 }
 0x1ba   :  { %v279_v42 = vmul.f32 0.01, %v273_v41  ;;  %vm277_vm6 = vcmp.ge.f32.partialorder %v273_v41, 0.0 }
 0x1bc   :  { %v281_v46 = vsel %vm277_vm6, %v273_v41, %v279_v42 }
 0x1bd   :  { %v287_v49 = vadd.f32 %v492_v45, %v281_v46 }
 0x1bf   :  { %v274_v43 = vpop.f32.mrf.mxu2 }
 0x1c0   :  { %v275_v44 = vadd.f32 %v491_v39, %v274_v43 }
 0x1c2   :  { %vm278_vm7 = vcmp.ge.f32.partialorder %v275_v44, 0.0  ;;  %v280_v47 = vmul.f32 0.01, %v275_v44 }
 0x1c4   :  { %v282_v48 = vsel %vm278_vm7, %v275_v44, %v280_v47 }
 0x1c5   :  { %v288_v50 = vadd.f32 %v492_v45, %v282_v48 }
 0x1c7   :  { %v289_v51 = vpack.c.bf16 %v288_v50, %v287_v49 }
 0x1c9   :  { %454 = vmatmul.msk.bf16.vlgmr.msra.gmra.mxu3 %vm126_vm0, %v289_v51 }
 0x24c   :  { %v322_v55 = vpop.f32.mrf.mxu3 }
 0x24d   :  { %v323_v56 = vadd.f32 %v493_v54, %v322_v55 }
 0x24f   :  { %v329_v57 = vmul.f32 0.01, %v323_v56  ;;  %vm327_vm8 = vcmp.ge.f32.partialorder %v323_v56, 0.0 }
 0x251   :  { %v331_v61 = vsel %vm327_vm8, %v323_v56, %v329_v57 }
 0x252   :  { %v337_v0 = vadd.f32 %v494_v60, %v331_v61 }
 0x254   :  { %v324_v58 = vpop.f32.mrf.mxu3 }
 0x255   :  { %v325_v59 = vadd.f32 %v493_v54, %v324_v58 }
 0x257   :  { %vm328_vm9 = vcmp.ge.f32.partialorder %v325_v59, 0.0  ;;  %v330_v62 = vmul.f32 0.01, %v325_v59 }
 0x259   :  { %v332_v63 = vsel %vm328_vm9, %v325_v59, %v330_v62 }
 0x25a   :  { %v338_v1 = vadd.f32 %v494_v60, %v332_v63 }
 0x25c   :  { %v339_v2 = vpack.c.bf16 %v338_v1, %v337_v0 }
 0x25e   :  { %463 = vmatmul.msk.bf16.vlgmr.msrb.gmra.mxu0 %vm126_vm0, %v339_v2 }
 0x2db   :  { %v372_v4 = vpop.f32.mrf.mxu0 }
 0x2dc   :  { %v373_v5 = vadd.f32 %v495_v3, %v372_v4 }
 0x2de   :  { %377 = vst [vmem:[#allocation8] sm:$0xff] %v373_v5 }
 0x2e3   :  { %v374_v6 = vpop.f32.mrf.mxu0 }
 0x2e4   :  { %v375_v7 = vadd.f32 %v495_v3, %v374_v6 }
 0x2e6   :  { %378 = vst [vmem:[#allocation8 + $0x8] sm:$0xff] %v375_v7 }
 0x2e7   :  { %391 = dma.vmem_to_hbm [thread:$0]  %s384_s27, 256, %s386_s29, [#allocation4], %s604_s30, %s604_s30, %s605_s16  }
 0x2e8   :  { %596 = dma.done.wait [#allocation4], 256  }
 0x2e9   :  { %597 = vsyncadd [#allocation4], 4294967040 }
 0x2ea   :  { %396 = vsyncpa [#allocation3], 1 }
 0x2eb   :  { %397 = vsyncpa [#allocation6], 1 }
 0x2ec   :  { %398 = vsyncpa [#allocation4], 1 }

</bundles_post_ra>
